<compile_context>
chip_gen: v7x
topology: tpu7x:2x2x1
jax: 0.10.0
libtpu: 0.0.40
codegen_flags: <defaults>
</compile_context>

<pallas_src>
import functools

import numpy as np
import jax
import jax.numpy as jnp
from jax.experimental import pallas as pl
from jax.experimental.pallas import tpu as pltpu


# ----------------------------------------------------------------------------
# Static graph construction (host-side numpy, deterministic)
# ----------------------------------------------------------------------------
def stride_edge(grid_size, stride):
    """Same edge list as StrideGraphSAGE.stride_edge. Returns (2, E) int array:
    row 0 = source, row 1 = target (messages flow source -> target)."""
    edges = []
    for i in range(grid_size):
        for j in range(grid_size):
            cur = i * grid_size + j
            if j < grid_size - stride:
                edges.append((cur, cur + stride))
            if i < grid_size - stride:
                edges.append((cur, cur + stride * grid_size))
            if j < grid_size - stride and i < grid_size - stride:
                edges.append((cur, cur + stride * grid_size + stride))
            if j > stride and i < grid_size - stride:
                edges.append((cur, cur + stride * grid_size - stride))
    return np.array(edges, dtype=np.int64).T


def build_mean_agg_matrix(edge_index, num_nodes):
    """Dense mean-aggregation matrix for ONE graph (torch_geometric SAGEConv
    aggr='mean'): A[t, s] = 1/in_deg(t) for each edge s->t; rows with no
    incoming edges stay 0 (scatter-mean of nothing is 0).

    NOTE: the kernel relies on the PyTorch quirk that edges are un-offset, so
    only the first image in the batch receives messages. If batch handling ever
    changes (offset edges), this sparsity assumption must change with it."""
    A = np.zeros((num_nodes, num_nodes), dtype=np.float32)
    src, dst = edge_index
    for s, d in zip(src, dst):
        A[d, s] += 1.0
    deg = A.sum(axis=1, keepdims=True)
    deg = np.where(deg > 0.0, deg, 1.0)
    return A / deg


# ----------------------------------------------------------------------------
# Pallas kernel: one batch image per grid step, ALL layers fused.
#   out = ELU( (Agg @ X) @ Wl_all  +  X @ Wr_all  +  b_all )
# where the aggregation term only exists for image 0 (un-offset-edge quirk).
# ----------------------------------------------------------------------------
def sage_elu_kernel(x_ref, agg_ref, wl_ref, wr_ref, b_ref, out_ref):
    x = x_ref[...]                                                 # (N, C) bf16

    # Root term + bias for every image: X @ Wr_all + b_all -> (N, L*inner) f32.
    out_ref[...] = (
        jnp.dot(x, wr_ref[...], preferred_element_type=jnp.float32) + b_ref[...]
    )

    # Message term. Only the first image's nodes have incoming edges (the
    # PyTorch forward passes un-offset edges with the batched node matrix), so
    # the aggregation matmul is skipped entirely for the other images — they
    # aggregate zeros and keep only bias + root term.
    @pl.when(pl.program_id(0) == 0)
    def _():
        neigh = jnp.dot(agg_ref[...], x, preferred_element_type=jnp.float32)
        out_ref[...] += jnp.dot(
            neigh.astype(jnp.bfloat16), wl_ref[...],
            preferred_element_type=jnp.float32)

    # ELU (alpha=1). Clamp before exp so the unselected branch never produces
    # +inf; exp runs on the EUP slot so it is effectively free.  (expm1's extra
    # precision here is < 1 f32 ulp, far below the bf16 operand rounding.)
    h = out_ref[...]
    out_ref[...] = jnp.where(h > 0.0, h, jnp.exp(jnp.minimum(h, 0.0)) - 1.0)


# ----------------------------------------------------------------------------
# Wrapper: layout plumbing (feature2graph / weight stacking / graph2feature)
# ----------------------------------------------------------------------------
@functools.partial(jax.jit, static_argnames=("grid_size",))
def stride_graph_sage_forward(x0, params, agg_small, *, grid_size):
    """x0: (B, hidden, G, G) NCHW float32.
    Returns (B, n_layers*hidden + hidden, G, G) float32 (layers..., then x0)."""
    B, C, H, W = x0.shape
    N = grid_size * grid_size
    L, _, inner = params["wl"].shape
    LI = L * inner

    # feature2graph: (B, C, H, W) -> (B, N, C), node-major per image.
    X = jnp.transpose(x0.reshape(B, C, N), (0, 2, 1)).astype(jnp.bfloat16)

    # Stack per-layer weights along the output dim -> one lane-dense matmul.
    wl_all = jnp.transpose(params["wl"], (1, 0, 2)).reshape(C, LI).astype(jnp.bfloat16)
    wr_all = jnp.transpose(params["wr"], (1, 0, 2)).reshape(C, LI).astype(jnp.bfloat16)
    b_all = params["b"].reshape(1, LI).astype(jnp.float32)
    agg = agg_small.astype(jnp.bfloat16)                            # (N, N)

    out = pl.pallas_call(
        sage_elu_kernel,
        out_shape=jax.ShapeDtypeStruct((B, N, LI), jnp.float32),
        grid_spec=pltpu.PrefetchScalarGridSpec(
            num_scalar_prefetch=0,
            grid=(B,),
            in_specs=[
                pl.BlockSpec((None, N, C), lambda b: (b, 0, 0)),   # X (per image)
                pl.BlockSpec((N, N), lambda b: (0, 0)),            # Agg (invariant)
                pl.BlockSpec((C, LI), lambda b: (0, 0)),           # Wl_all (invariant)
                pl.BlockSpec((C, LI), lambda b: (0, 0)),           # Wr_all (invariant)
                pl.BlockSpec((1, LI), lambda b: (0, 0)),           # bias (invariant)
            ],
            out_specs=pl.BlockSpec((None, N, LI), lambda b: (b, 0, 0)),
        ),
        compiler_params=pltpu.CompilerParams(
            dimension_semantics=("parallel",),          # images shard across TCs (v7x)
            vmem_limit_bytes=48 * 1024 * 1024,          # headroom for grid_size=33 on v5e
        ),
    )(X, agg, wl_all, wr_all, b_all)

    # Split the stacked layer outputs and apply graph2feature: per (image, layer)
    # the (N, inner) block is raw-viewed into (hidden, G, G)  (requires inner == C).
    feats = jnp.transpose(out.reshape(B, N, L, inner), (0, 2, 1, 3))   # (B, L, N, inner)
    feats = feats.reshape(B, L * C, grid_size, grid_size)

    # output = cat([layer_0, ..., layer_{L-1}, x0], dim=1)
    return jnp.concatenate([feats, x0.astype(jnp.float32)], axis=1)


# ----------------------------------------------------------------------------
# Pure-JAX reference (f32) mirroring the PyTorch semantics, for a sanity check.
# ----------------------------------------------------------------------------
def reference_forward(x0, params, agg_small, grid_size):
    B, C, H, W = x0.shape
    N = grid_size * grid_size
    X = jnp.transpose(x0.reshape(B, C, N), (0, 2, 1))              # (B, N, C)
    L = params["wl"].shape[0]
    neigh0 = agg_small.astype(jnp.float32) @ X[0]                  # only graph 0 has edges
    neigh = jnp.concatenate(
        [neigh0[None], jnp.zeros((B - 1, N, C), jnp.float32)], axis=0)
    feats = []
    for l in range(L):
        h = (jnp.einsum("bnc,ci->bni", neigh, params["wl"][l])
             + jnp.einsum("bnc,ci->bni", X, params["wr"][l])
             + params["b"][l])
        h = jnp.where(h > 0.0, h, jnp.exp(jnp.minimum(h, 0.0)) - 1.0)
        feats.append(h.reshape(B, C, grid_size, grid_size))        # raw graph2feature view
    feats.append(x0)
    return jnp.concatenate(feats, axis=1)


# ----------------------------------------------------------------------------
# Deterministic parameter init (SAGEConv: lin_l has bias, lin_r has none;
# weights stored pre-transposed (hidden, inner)).
# ----------------------------------------------------------------------------
def init_params(key, n_layers, hidden, inner):
    if n_layers > 8:          # cap from StrideGraphSAGE.__init__
        n_layers = 8
    k0, k1, k2 = jax.random.split(key, 3)
    scale = 1.0 / np.sqrt(hidden)
    wl = jax.random.uniform(k0, (n_layers, hidden, inner), jnp.float32, -scale, scale)
    wr = jax.random.uniform(k1, (n_layers, hidden, inner), jnp.float32, -scale, scale)
    b = jax.random.uniform(k2, (n_layers, 1, inner), jnp.float32, -scale, scale)
    return {"wl": wl, "wr": wr, "b": b}


if __name__ == "__main__":
    # Small, self-consistent shapes (original uses grid_size=33; here G=8).
    hidden = 32
    inner = 32            # must equal hidden for the raw graph2feature view
    n_layers = 4          # L * inner = 128 -> lane-dense output stores
    graph_stride = 2
    grid_size = 8
    batch = 2

    key = jax.random.PRNGKey(0)
    kx, kp = jax.random.split(key)
    x = jax.random.normal(kx, (batch, hidden, grid_size, grid_size), jnp.float32)
    params = init_params(kp, n_layers, hidden, inner)

    N = grid_size * grid_size
    edge_index = stride_edge(grid_size, graph_stride)
    # Only the first-graph N x N block is ever nonzero (un-offset edges), so we
    # build and ship only that block.
    agg_small = jnp.asarray(build_mean_agg_matrix(edge_index, N))

    out = stride_graph_sage_forward(x, params, agg_small, grid_size=grid_size)
    jax.block_until_ready(out)
    assert out.shape == (batch, (n_layers + 1) * hidden, grid_size, grid_size)

    # Sanity check against the pure-JAX f32 reference (loose tolerance: the
    # kernel uses bf16 MXU operands with f32 accumulation, per the perf review).
    ref = reference_forward(x, params, agg_small, grid_size)
    np.testing.assert_allclose(np.asarray(out), np.asarray(ref), rtol=5e-2, atol=5e-2)

    print("KERNEL_OK")
</pallas_src>

<mosaic_0001>
module attributes {stable_mosaic.version = 11 : i64} {
  func.func @sage_elu_kernel(%arg0: i32, %arg1: memref<1x64x32xbf16, #tpu.memory_space<vmem>>, %arg2: memref<64x64xbf16, #tpu.memory_space<vmem>>, %arg3: memref<32x128xbf16, #tpu.memory_space<vmem>>, %arg4: memref<32x128xbf16, #tpu.memory_space<vmem>>, %arg5: memref<1x128xf32, #tpu.memory_space<vmem>>, %arg6: memref<1x64x128xf32, #tpu.memory_space<vmem>>) attributes {dimension_semantics = [#tpu.dimension_semantics<parallel>], iteration_bounds = array<i64: 2>, scalar_prefetch = 0 : i64, scratch_operands = 0 : i64, tpu.core_type = #tpu.core_type<tc>, window_params = [{transform_indices = @transform_0, window_bounds = array<i64: 1, 64, 32>}, {pipeline_mode = #tpu.pipeline_mode<synchronous>, transform_indices = @transform_1, window_bounds = array<i64: 64, 64>}, {pipeline_mode = #tpu.pipeline_mode<synchronous>, transform_indices = @transform_2, window_bounds = array<i64: 32, 128>}, {pipeline_mode = #tpu.pipeline_mode<synchronous>, transform_indices = @transform_3, window_bounds = array<i64: 32, 128>}, {pipeline_mode = #tpu.pipeline_mode<synchronous>, transform_indices = @transform_4, window_bounds = array<i64: 1, 128>}, {transform_indices = @transform_5, window_bounds = array<i64: 1, 64, 128>}]} {
    %c0 = arith.constant 0 : index
    %c0_0 = arith.constant 0 : index
    %c0_1 = arith.constant 0 : index
    %0 = vector.load %arg1[%c0, %c0_0, %c0_1] : memref<1x64x32xbf16, #tpu.memory_space<vmem>>, vector<1x64x32xbf16>
    %1 = vector.shape_cast %0 : vector<1x64x32xbf16> to vector<64x32xbf16>
    %c0_2 = arith.constant 0 : index
    %c0_3 = arith.constant 0 : index
    %2 = vector.load %arg4[%c0_2, %c0_3] : memref<32x128xbf16, #tpu.memory_space<vmem>>, vector<32x128xbf16>
    %cst = arith.constant dense<0.000000e+00> : vector<64x128xf32>
    %3 = tpu.matmul %1, %2, %cst {dimension_numbers = #tpu.dot_dimension_numbers<[1], [0], [0], [1], [0, 0, 1, 1], [], []>} : vector<64x32xbf16>, vector<32x128xbf16>, vector<64x128xf32> -> vector<64x128xf32>
    %c0_4 = arith.constant 0 : index
    %c0_5 = arith.constant 0 : index
    %4 = vector.load %arg5[%c0_4, %c0_5] : memref<1x128xf32, #tpu.memory_space<vmem>>, vector<1x128xf32>
    %5 = vector.broadcast %4 : vector<1x128xf32> to vector<64x128xf32>
    %6 = arith.addf %3, %5 : vector<64x128xf32>
    %c0_6 = arith.constant 0 : index
    %c0_7 = arith.constant 0 : index
    %c0_8 = arith.constant 0 : index
    %7 = vector.load %arg6[%c0_6, %c0_7, %c0_8] : memref<1x64x128xf32, #tpu.memory_space<vmem>>, vector<1x64x128xf32>
    %8 = vector.shape_cast %7 : vector<1x64x128xf32> to vector<64x128xf32>
    %9 = vector.shape_cast %6 : vector<64x128xf32> to vector<1x64x128xf32>
    tpu.vector_store %arg6[%c0_6, %c0_7, %c0_8], %9 {strides = array<i32>} : memref<1x64x128xf32, #tpu.memory_space<vmem>>, vector<1x64x128xf32>,
    %c0_i32 = arith.constant 0 : i32
    %10 = arith.cmpi eq, %arg0, %c0_i32 : i32
    %11 = arith.extui %10 : i1 to i32
    %c0_i32_9 = arith.constant 0 : i32
    %12 = arith.cmpi ne, %11, %c0_i32_9 : i32
    scf.if %12 {
      %c0_19 = arith.constant 0 : index
      %c0_20 = arith.constant 0 : index
      %26 = vector.load %arg2[%c0_19, %c0_20] : memref<64x64xbf16, #tpu.memory_space<vmem>>, vector<64x64xbf16>
      %cst_21 = arith.constant dense<0.000000e+00> : vector<64x32xf32>
      %27 = tpu.matmul %26, %1, %cst_21 {dimension_numbers = #tpu.dot_dimension_numbers<[1], [0], [0], [1], [0, 0, 1, 1], [], []>} : vector<64x64xbf16>, vector<64x32xbf16>, vector<64x32xf32> -> vector<64x32xf32>
      %c0_22 = arith.constant 0 : index
      %c0_23 = arith.constant 0 : index
      %c0_24 = arith.constant 0 : index
      %28 = vector.load %arg6[%c0_22, %c0_23, %c0_24] : memref<1x64x128xf32, #tpu.memory_space<vmem>>, vector<1x64x128xf32>
      %29 = vector.shape_cast %28 : vector<1x64x128xf32> to vector<64x128xf32>
      %30 = arith.truncf %27 : vector<64x32xf32> to vector<64x32xbf16>
      %c0_25 = arith.constant 0 : index
      %c0_26 = arith.constant 0 : index
      %31 = vector.load %arg3[%c0_25, %c0_26] : memref<32x128xbf16, #tpu.memory_space<vmem>>, vector<32x128xbf16>
      %cst_27 = arith.constant dense<0.000000e+00> : vector<64x128xf32>
      %32 = tpu.matmul %30, %31, %cst_27 {dimension_numbers = #tpu.dot_dimension_numbers<[1], [0], [0], [1], [0, 0, 1, 1], [], []>} : vector<64x32xbf16>, vector<32x128xbf16>, vector<64x128xf32> -> vector<64x128xf32>
      %33 = arith.addf %29, %32 : vector<64x128xf32>
      %c0_28 = arith.constant 0 : index
      %c0_29 = arith.constant 0 : index
      %c0_30 = arith.constant 0 : index
      %34 = vector.load %arg6[%c0_28, %c0_29, %c0_30] : memref<1x64x128xf32, #tpu.memory_space<vmem>>, vector<1x64x128xf32>
      %35 = vector.shape_cast %34 : vector<1x64x128xf32> to vector<64x128xf32>
      %36 = vector.shape_cast %33 : vector<64x128xf32> to vector<1x64x128xf32>
      tpu.vector_store %arg6[%c0_28, %c0_29, %c0_30], %36 {strides = array<i32>} : memref<1x64x128xf32, #tpu.memory_space<vmem>>, vector<1x64x128xf32>,
    } else {
    }
    %c0_10 = arith.constant 0 : index
    %c0_11 = arith.constant 0 : index
    %c0_12 = arith.constant 0 : index
    %13 = vector.load %arg6[%c0_10, %c0_11, %c0_12] : memref<1x64x128xf32, #tpu.memory_space<vmem>>, vector<1x64x128xf32>
    %14 = vector.shape_cast %13 : vector<1x64x128xf32> to vector<64x128xf32>
    %cst_13 = arith.constant 0.000000e+00 : f32
    %15 = vector.broadcast %cst_13 : f32 to vector<64x128xf32>
    %16 = arith.cmpf ogt, %14, %15 : vector<64x128xf32>
    %cst_14 = arith.constant 0.000000e+00 : f32
    %17 = vector.broadcast %cst_14 : f32 to vector<64x128xf32>
    %18 = arith.minimumf %14, %17 : vector<64x128xf32>
    %19 = math.exp %18 : vector<64x128xf32>
    %cst_15 = arith.constant 1.000000e+00 : f32
    %20 = vector.broadcast %cst_15 : f32 to vector<64x128xf32>
    %21 = arith.subf %19, %20 : vector<64x128xf32>
    %22 = arith.select %16, %14, %21 : vector<64x128xi1>, vector<64x128xf32>
    %c0_16 = arith.constant 0 : index
    %c0_17 = arith.constant 0 : index
    %c0_18 = arith.constant 0 : index
    %23 = vector.load %arg6[%c0_16, %c0_17, %c0_18] : memref<1x64x128xf32, #tpu.memory_space<vmem>>, vector<1x64x128xf32>
    %24 = vector.shape_cast %23 : vector<1x64x128xf32> to vector<64x128xf32>
    %25 = vector.shape_cast %22 : vector<64x128xf32> to vector<1x64x128xf32>
    tpu.vector_store %arg6[%c0_16, %c0_17, %c0_18], %25 {strides = array<i32>} : memref<1x64x128xf32, #tpu.memory_space<vmem>>, vector<1x64x128xf32>,
    return
  }
  func.func @transform_0(%arg0: i32) -> (i32, i32, i32) {
    %c0_i32 = arith.constant 0 : i32
    %c0_i32_0 = arith.constant 0 : i32
    %c0_i32_1 = arith.constant 0 : i32
    return %arg0, %c0_i32, %c0_i32_0 : i32, i32, i32
  }
  func.func @transform_1(%arg0: i32) -> (i32, i32) {
    %c0_i32 = arith.constant 0 : i32
    %c0_i32_0 = arith.constant 0 : i32
    %c0_i32_1 = arith.constant 0 : i32
    return %c0_i32, %c0_i32_0 : i32, i32
  }
  func.func @transform_2(%arg0: i32) -> (i32, i32) {
    %c0_i32 = arith.constant 0 : i32
    %c0_i32_0 = arith.constant 0 : i32
    %c0_i32_1 = arith.constant 0 : i32
    return %c0_i32, %c0_i32_0 : i32, i32
  }
  func.func @transform_3(%arg0: i32) -> (i32, i32) {
    %c0_i32 = arith.constant 0 : i32
    %c0_i32_0 = arith.constant 0 : i32
    %c0_i32_1 = arith.constant 0 : i32
    return %c0_i32, %c0_i32_0 : i32, i32
  }
  func.func @transform_4(%arg0: i32) -> (i32, i32) {
    %c0_i32 = arith.constant 0 : i32
    %c0_i32_0 = arith.constant 0 : i32
    %c0_i32_1 = arith.constant 0 : i32
    return %c0_i32, %c0_i32_0 : i32, i32
  }
  func.func @transform_5(%arg0: i32) -> (i32, i32, i32) {
    %c0_i32 = arith.constant 0 : i32
    %c0_i32_0 = arith.constant 0 : i32
    %c0_i32_1 = arith.constant 0 : i32
    return %arg0, %c0_i32, %c0_i32_0 : i32, i32, i32
  }
}

</mosaic_0001>

<bundles_post_ra>
// kernel: stride_graph_sage_forward.1
= control target key start
LH: loop header
LB: loop body
LE: loop exit
PB: predicated region body
PF: predicated region fallthrough
CT: control target
= control target key end

     0   :  { %s902_s18 = smov 0   ;;  %s1005_s0 = inlined_call_operand.vmem [shape: bf16[2,64,32], index: 0, kind: input, shape index: {}]   ;;  %s1006_s1 = inlined_call_operand.vmem [shape: bf16[64,64], index: 1, kind: input, shape index: {}]   ;;  %s1007_s2 = inlined_call_operand.vmem [shape: bf16[32,128], index: 2, kind: input, shape index: {}]   ;;  %s1008_s3 = inlined_call_operand.vmem [shape: bf16[32,128], index: 3, kind: input, shape index: {}]   ;;  %s1009_s4 = inlined_call_operand.vmem [shape: f32[1,128], index: 4, kind: input, shape index: {}]   ;;  %s1010_s5 = inlined_call_operand.vmem [shape: f32[2,64,128], index: 5, kind: output, shape index: {}]  }
   0x1 LB: > { %s908_s19 = sadd.s32 4294967295, %s870_s18   ;;  %p721_p0 = scmp.ge.s32.totalorder %s870_s18, 1  ;;  %s870_s18 = sphi %s902_s18, %s15_s18  }
   0x2   : > { %p187_p1 = scmp.lt.s32.totalorder %s870_s18, 3 }
   0x4   : > { %p188_p2 = pnand %p721_p0, %p187_p1 }
   0x5   : > { %v836_v0 = vld [vmem:[%s1008_s3] sm:$0xff] (!%p188_p2)   ;;  %p215_p3 = scmp.lt.s32.totalorder (!%p188_p2), %s908_s19, 1  ;;  %v837_v1 = vld [vmem:[%s1008_s3 + $0x8] sm:$0xff] (!%p188_p2)   ;;  %vm277_vm0 = vcmask (!%p188_p2), 261120   ;;  %p737_p4 = scmp.ne.s32.totalorder (!%p188_p2), %s908_s19, 0 }
   0x6   : > { %191 = sbr.rel (%p188_p2) target bundleno = 709 (0x2c5), region = 40  ;;  %784 = vmatprep.subr.bf16.mxu0 (!%p188_p2), %v836_v0  ;;  %824 = vmatprep.subr.bf16.mxu1 (!%p188_p2), %v836_v0  ;;  %v726_v6 = vld [vmem:[%s1009_s4] ss:$0 sm:$0xff] (!%p188_p2) }
   0x7   : > { %785 = vmatpush3.bf16.msra.mxu0 (!%p188_p2), %v836_v0  ;;  %826 = vmatpush3.bf16.msra.mxu1 (!%p188_p2), %v836_v0 }
   0x8   : > { %786 = vmatprep.subr.bf16.mxu0 (!%p188_p2), %v837_v1  ;;  %825 = vmatprep.subr.bf16.mxu1 (!%p188_p2), %v837_v1 }
   0xb   : > { %787 = vmatpush3.bf16.msra.mxu0 (!%p188_p2), %v837_v1  ;;  %827 = vmatpush3.bf16.msra.mxu1 (!%p188_p2), %v837_v1 }
   0xd   : > { %s216_s24 = scalar_select %p215_p3, %s908_s19, 1 }
   0xe   : > { %v842_v23 = vld [vmem:[%s1006_s1] sm:$0xff] (!%p737_p4)   ;;  %vm399_vm1 = vcmask (!%p737_p4), 523264   ;;  %v843_v25 = vld [vmem:[%s1006_s1 + $0x8] sm:$0xff] (!%p737_p4)   ;;  %v844_v26 = vld [vmem:[%s1006_s1 + $0x10] sm:$0xff] (!%p737_p4)  }
   0xf   : > { %s762_s25 = sshll.u32 %s216_s24, 5  ;;  %s763_s29 = sshll.u32 %s216_s24, 6  ;;  %v846_v24 = vld [vmem:[%s1007_s2] sm:$0xff] (!%p737_p4)   ;;  %v845_v27 = vld [vmem:[%s1006_s1 + $0x18] sm:$0xff] (!%p737_p4)   ;;  %v847_v28 = vld [vmem:[%s1007_s2 + $0x8] sm:$0xff] (!%p737_p4)  }
  0x10   : > { %s219_s28 = scalar_lea.vmem %s1005_s0, %s762_s25  ;;  %s933_s9 = scalar_lea.vmem %s1010_s5, %s763_s29  ;;  %812 = vmatprep.subr.bf16.mxu1 (!%p737_p4), %v846_v24 }
  0x11   : > { %v838_v2 = vld [vmem:[%s219_s28] sm:$0xff]   ;;  %v839_v3 = vld [vmem:[%s219_s28 + $0x10] sm:$0xff]   ;;  %v840_v4 = vld [vmem:[%s219_s28 + $0x8] sm:$0xff]  }
  0x12   : > { %788 = vmatprep.mubr.msk.bf16.mxu0 %vm277_vm0, %v838_v2  ;;  %792 = vmatprep.mubr.msk.bf16.mxu1 %vm277_vm0, %v839_v3  ;;  %v841_v5 = vld [vmem:[%s219_s28 + $0x18] sm:$0xff]  }
  0x13   : > { %789 = vmatmul.mubr.msk.bf16.vlgmr.msra.gmra.mrb[0].mxu0 %vm277_vm0, %v840_v4  ;;  %793 = vmatmul.mubr.msk.bf16.vlgmr.msra.gmra.mrb[0].mxu1 %vm277_vm0, %v841_v5 }
  0x14   : > { %796 = vmatprep.subr.bf16.mxu0 (!%p737_p4), %v838_v2  ;;  %804 = vmatprep.mubr.msk.bf16.mxu0 (!%p737_p4), %vm399_vm1, %v842_v23 }
  0x15   : > { %797 = vmatpush3.bf16.msra.mxu0 (!%p737_p4), %v838_v2  ;;  %813 = vmatpush3.bf16.msra.mxu1 (!%p737_p4), %v846_v24 }
  0x16   : > { %798 = vmatprep.subr.bf16.mxu0 (!%p737_p4), %v840_v4  ;;  %814 = vmatprep.subr.bf16.mxu1 (!%p737_p4), %v847_v28 }
  0x19   : > { %799 = vmatpush3.bf16.msra.mxu0 (!%p737_p4), %v840_v4  ;;  %815 = vmatpush3.bf16.msra.mxu1 (!%p737_p4), %v847_v28 }
  0x1a   : > { %800 = vmatprep.subr.bf16.mxu0 (!%p737_p4), %v839_v3 }
  0x1d   : > { %801 = vmatpush3.bf16.msra.mxu0 (!%p737_p4), %v839_v3 }
  0x1e   : > { %802 = vmatprep.subr.bf16.mxu0 (!%p737_p4), %v841_v5 }
  0x21   : > { %803 = vmatpush3.bf16.msra.mxu0 (!%p737_p4), %v841_v5 }
  0xe6   : > { %v790_v7 = vpop.f32.mrb[0].mxu0  ;;  %v794_v9 = vpop.f32.mrb[0].mxu1  ;;  %366 = sbr.rel (%p737_p4) target bundleno = 677 (0x2a5), region = 44 }
  0xe7   : > { %v333_v8 = vadd.f32 %v790_v7, %v726_v6  ;;  %v324_v10 = vpop.f32.mrb[1].mxu0  ;;  %v349_v11 = vadd.f32 %v794_v9, %v726_v6  ;;  %v340_v13 = vpop.f32.mrb[1].mxu1 }
  0xe8   : > { %v325_v12 = vadd.f32 %v726_v6, %v324_v10  ;;  %v791_v14 = vpop.f32.mrb[2].mxu0  ;;  %v341_v15 = vadd.f32 %v726_v6, %v340_v13  ;;  %v795_v17 = vpop.f32.mrb[2].mxu1 }
  0xe9   : > { %357 = vst [vmem:[%s933_s9 + $0x10] sm:$0xff] %v333_v8  ;;  %v336_v16 = vadd.f32 %v791_v14, %v726_v6  ;;  %v327_v18 = vpop.f32.mrb[3].mxu0  ;;  %361 = vst [vmem:[%s933_s9 + $0x30] sm:$0xff] %v349_v11  ;;  %v352_v19 = vadd.f32 %v795_v17, %v726_v6  ;;  %v343_v21 = vpop.f32.mrb[3].mxu1  ;;  %805 = vmatmul.mubr.msk.bf16.vlgmr.msra.gmra.mrb[0].mxu0 (!%p737_p4), %vm399_vm1, %v843_v25 }
  0xea   : > { %355 = vst [vmem:[%s933_s9] sm:$0xff] %v325_v12  ;;  %v328_v20 = vadd.f32 %v726_v6, %v327_v18  ;;  %359 = vst [vmem:[%s933_s9 + $0x20] sm:$0xff] %v341_v15  ;;  %v344_v22 = vadd.f32 %v726_v6, %v343_v21  ;;  %808 = vmatprep.mubr.msk.bf16.mxu0 (!%p737_p4), %vm399_vm1, %v844_v26 }
  0xeb   : > { %358 = vst [vmem:[%s933_s9 + $0x18] sm:$0xff] %v336_v16  ;;  %362 = vst [vmem:[%s933_s9 + $0x38] sm:$0xff] %v352_v19 }
  0xec   : > { %356 = vst [vmem:[%s933_s9 + $0x8] sm:$0xff] %v328_v20  ;;  %360 = vst [vmem:[%s933_s9 + $0x28] sm:$0xff] %v344_v22 }
  0xf0   : > { %v479_v41 = vld [vmem:[%s933_s9 + $0x10] sm:$0xff] }
  0xf1   : > { %809 = vmatmul.mubr.msk.bf16.gmra.mrb[4].mxu0 %vm399_vm1, %v845_v27  ;;  %v477_v42 = vld [vmem:[%s933_s9] sm:$0xff]  ;;  %v483_v53 = vld [vmem:[%s933_s9 + $0x30] sm:$0xff] }
  0xf2   : > { %v480_v44 = vld [vmem:[%s933_s9 + $0x18] sm:$0xff]  ;;  %v481_v54 = vld [vmem:[%s933_s9 + $0x20] sm:$0xff] }
  0xf3   : > { %v478_v47 = vld [vmem:[%s933_s9 + $0x8] sm:$0xff]  ;;  %v484_v56 = vld [vmem:[%s933_s9 + $0x38] sm:$0xff] }
  0xf4   : > { %v482_v59 = vld [vmem:[%s933_s9 + $0x28] sm:$0xff] }
 0x1bc   : > { %v806_v29 = vpop.f32.mrb[0].mxu0 }
 0x1bd   : > { %v446_v30 = vpop.f32.mrb[1].mxu0 }
 0x1be   : > { %v807_v31 = vpop.f32.mrb[2].mxu0 }
 0x1bf   : > { %v486_v32 = vpack.c.bf16 %v807_v31, %v806_v29  ;;  %v449_v33 = vpop.f32.mrb[3].mxu0 }
 0x1c0   : > { %v485_v34 = vpack.c.bf16 %v449_v33, %v446_v30 }
 0x1c2   : > { %816 = vmatprep.mubr.msk.bf16.mxu1 %vm277_vm0, %v485_v34 }
 0x1c3   : > { %817 = vmatmul.mubr.msk.bf16.vlgmr.msra.gmra.mrb[0].mxu1 %vm277_vm0, %v486_v32 }
 0x1c4   : > { %v810_v35 = vpop.f32.mrb[4].mxu0 }
 0x1c5   : > { %v462_v36 = vpop.f32.mrb[5].mxu0 }
 0x1c6   : > { %v811_v37 = vpop.f32.mrb[6].mxu0 }
 0x1c7   : > { %v488_v38 = vpack.c.bf16 %v811_v37, %v810_v35  ;;  %v465_v39 = vpop.f32.mrb[7].mxu0 }
 0x1c8   : > { %v487_v40 = vpack.c.bf16 %v465_v39, %v462_v36 }
 0x1ca   : > { %820 = vmatprep.mubr.msk.bf16.mxu1 %vm277_vm0, %v487_v40 }
 0x1cb   : > { %821 = vmatmul.mubr.msk.bf16.gmra.mrb[4].mxu1 %vm277_vm0, %v488_v38 }
 0x296   : > { %v818_v43 = vpop.f32.mrb[0].mxu1 }
 0x297   : > { %v584_v45 = vadd.f32 %v818_v43, %v479_v41  ;;  %v551_v46 = vpop.f32.mrb[1].mxu1 }
 0x298   : > { %v582_v48 = vadd.f32 %v551_v46, %v477_v42  ;;  %v819_v49 = vpop.f32.mrb[2].mxu1 }
 0x299   : > { %592 = vst [vmem:[%s933_s9 + $0x10] sm:$0xff] %v584_v45  ;;  %v585_v50 = vadd.f32 %v819_v49, %v480_v44  ;;  %v554_v51 = vpop.f32.mrb[3].mxu1 }
 0x29a   : > { %590 = vst [vmem:[%s933_s9] sm:$0xff] %v582_v48  ;;  %v583_v52 = vadd.f32 %v554_v51, %v478_v47 }
 0x29b   : > { %593 = vst [vmem:[%s933_s9 + $0x18] sm:$0xff] %v585_v50 }
 0x29c   : > { %591 = vst [vmem:[%s933_s9 + $0x8] sm:$0xff] %v583_v52 }
 0x29e   : > { %v822_v55 = vpop.f32.mrb[4].mxu1 }
 0x29f   : > { %v588_v57 = vadd.f32 %v822_v55, %v483_v53  ;;  %v567_v58 = vpop.f32.mrb[5].mxu1 }
 0x2a0   : > { %v586_v60 = vadd.f32 %v567_v58, %v481_v54  ;;  %v823_v61 = vpop.f32.mrb[6].mxu1 }
 0x2a1   : > { %596 = vst [vmem:[%s933_s9 + $0x30] sm:$0xff] %v588_v57  ;;  %v589_v62 = vadd.f32 %v823_v61, %v484_v56  ;;  %v570_v63 = vpop.f32.mrb[7].mxu1 }
 0x2a2   : > { %594 = vst [vmem:[%s933_s9 + $0x20] sm:$0xff] %v586_v60  ;;  %v587_v0 = vadd.f32 %v570_v63, %v482_v59 }
 0x2a3   : > { %597 = vst [vmem:[%s933_s9 + $0x38] sm:$0xff] %v589_v62 }
 0x2a4   : > { %595 = vst [vmem:[%s933_s9 + $0x28] sm:$0xff] %v587_v0 }
 0x2a5 PF:  {}
 0x2a8   : > { %v600_v3 = vld [vmem:[%s933_s9 + $0x10] sm:$0xff] }
 0x2a9   : > { %v598_v1 = vld [vmem:[%s933_s9] sm:$0xff]  ;;  %v616_v8 = vmin.f32 %v600_v3, 0.0  ;;  %v604_v11 = vld [vmem:[%s933_s9 + $0x30] sm:$0xff]  ;;  %vm608_vm4 = vcmp.gt.f32.partialorder %v600_v3, 0.0 }
 0x2aa   : > { %v614_v4 = vmin.f32 %v598_v1, 0.0  ;;  %v601_v6 = vld [vmem:[%s933_s9 + $0x18] sm:$0xff]  ;;  %v602_v7 = vld [vmem:[%s933_s9 + $0x20] sm:$0xff]  ;;  %v620_v19 = vmin.f32 %v604_v11, 0.0  ;;  %vm606_vm2 = vcmp.gt.f32.partialorder %v598_v1, 0.0  ;;  %vm612_vm8 = vcmp.gt.f32.partialorder %v604_v11, 0.0 }
 0x2ab   : > { %v599_v2 = vld [vmem:[%s933_s9 + $0x8] sm:$0xff]  ;;  %v617_v9 = vmin.f32 %v601_v6, 0.0  ;;  %v618_v14 = vmin.f32 %v602_v7, 0.0  ;;  %v626_v15 = vmul.f32 1.442695, %v616_v8  ;;  %v605_v20 = vld [vmem:[%s933_s9 + $0x38] sm:$0xff] }
 0x2ac   : > { %v615_v5 = vmin.f32 %v599_v2, 0.0  ;;  %v603_v10 = vld [vmem:[%s933_s9 + $0x28] sm:$0xff]  ;;  %v622_v12 = vmul.f32 1.442695, %v614_v4  ;;  %v621_v22 = vmin.f32 %v605_v20, 0.0  ;;  %vm607_vm3 = vcmp.gt.f32.partialorder %v599_v2, 0.0 }
 0x2ad   : > { %v628_v16 = vmul.f32 1.442695, %v617_v9  ;;  %v619_v17 = vmin.f32 %v603_v10, 0.0  ;;  %v630_v18 = vmul.f32 1.442695, %v618_v14  ;;  %vm609_vm5 = vcmp.gt.f32.partialorder %v601_v6, 0.0 }
 0x2ae   : > { %v624_v13 = vmul.f32 1.442695, %v615_v5  ;;  %848 = vpow2.f32 %v622_v12  ;;  %v634_v23 = vmul.f32 1.442695, %v620_v19  ;;  %v636_v24 = vmul.f32 1.442695, %v621_v22 }
 0x2af   : > { %v632_v21 = vmul.f32 1.442695, %v619_v17  ;;  %vm610_vm6 = vcmp.gt.f32.partialorder %v602_v7, 0.0  ;;  %vm611_vm7 = vcmp.gt.f32.partialorder %v603_v10, 0.0  ;;  %vm613_vm9 = vcmp.gt.f32.partialorder %v605_v20, 0.0 }
 0x2b0   : > { %850 = vpow2.f32 %v624_v13 }
 0x2b1   : > { %852 = vpow2.f32 %v626_v15 }
 0x2b2   : > { %854 = vpow2.f32 %v628_v16 }
 0x2b3   : > { %856 = vpow2.f32 %v630_v18 }
 0x2b4   : > { %858 = vpow2.f32 %v632_v21 }
 0x2b5   : > { %860 = vpow2.f32 %v634_v23 }
 0x2b6   : > { %862 = vpow2.f32 %v636_v24 }
 0x2b8   : > { %v849_v25 = vpop.eup %848 }
 0x2b9   : > { %v752_v27 = vadd.f32 -1.0, %v849_v25 }
 0x2ba   : > { %v851_v26 = vpop.eup %850 }
 0x2bb   : > { %v853_v28 = vpop.eup %852  ;;  %v753_v29 = vadd.f32 -1.0, %v851_v26  ;;  %v646_v31 = vsel %vm606_vm2, %v598_v1, %v752_v27 }
 0x2bc   : > { %v855_v30 = vpop.eup %854  ;;  %v754_v32 = vadd.f32 -1.0, %v853_v28  ;;  %654 = vst [vmem:[%s933_s9] sm:$0xff] %v646_v31 }
 0x2bd   : > { %v857_v33 = vpop.eup %856  ;;  %v647_v34 = vsel %vm607_vm3, %v599_v2, %v753_v29  ;;  %v755_v35 = vadd.f32 -1.0, %v855_v30 }
 0x2be   : > { %v859_v36 = vpop.eup %858  ;;  %655 = vst [vmem:[%s933_s9 + $0x8] sm:$0xff] %v647_v34  ;;  %v648_v37 = vsel %vm608_vm4, %v600_v3, %v754_v32  ;;  %v756_v38 = vadd.f32 -1.0, %v857_v33 }
 0x2bf   : > { %v861_v39 = vpop.eup %860  ;;  %656 = vst [vmem:[%s933_s9 + $0x10] sm:$0xff] %v648_v37  ;;  %v649_v40 = vsel %vm609_vm5, %v601_v6, %v755_v35  ;;  %v757_v41 = vadd.f32 -1.0, %v859_v36 }
 0x2c0   : > { %v863_v42 = vpop.eup %862  ;;  %657 = vst [vmem:[%s933_s9 + $0x18] sm:$0xff] %v649_v40  ;;  %v650_v43 = vsel %vm610_vm6, %v602_v7, %v756_v38  ;;  %v758_v44 = vadd.f32 -1.0, %v861_v39 }
 0x2c1   : > { %658 = vst [vmem:[%s933_s9 + $0x20] sm:$0xff] %v650_v43  ;;  %v651_v45 = vsel %vm611_vm7, %v603_v10, %v757_v41  ;;  %v759_v46 = vadd.f32 -1.0, %v863_v42 }
 0x2c2   : > { %659 = vst [vmem:[%s933_s9 + $0x28] sm:$0xff] %v651_v45  ;;  %v652_v47 = vsel %vm612_vm8, %v604_v11, %v758_v44 }
 0x2c3   : > { %660 = vst [vmem:[%s933_s9 + $0x30] sm:$0xff] %v652_v47  ;;  %v653_v48 = vsel %vm613_vm9, %v605_v20, %v759_v46 }
 0x2c4   : > { %661 = vst [vmem:[%s933_s9 + $0x38] sm:$0xff] %v653_v48 }
 0x2c5 PF: > { %s15_s18 = sadd.s32 1, %s870_s18  }
 0x2c6   : > { %p12_p5 = scmp.ge.s32.totalorder %s15_s18, 4  }
 0x2c8   :  { %14 = sbr.rel (!%p12_p5) target bundleno = 1 (0x1), region = 74 }

</bundles_post_ra>
